<compile_context>
chip_gen: v7x
topology: tpu7x:2x2x1
jax: 0.10.0
libtpu: 0.0.40
codegen_flags: <defaults>
</compile_context>

<pallas_src>
import jax
import jax.numpy as jnp
from jax.experimental import pallas as pl
from jax.experimental.pallas import tpu as pltpu

BN_EPS = 1e-5


def _onelayer_kernel(x_ref, gamma_ref, beta_ref, w1_ref, b1_ref, w2_ref, b2_ref, o_ref):
    x = x_ref[...].astype(jnp.float32)                        # (B, F)

    # BatchNorm1d (training mode): per-feature batch mean / biased variance.
    mean = jnp.mean(x, axis=0, keepdims=True)                 # (1, F)
    var = jnp.mean((x - mean) * (x - mean), axis=0, keepdims=True)

    # Fold normalize + affine into one scale/shift (computed on (1, F) rows).
    scale = gamma_ref[...] * jax.lax.rsqrt(var + BN_EPS)      # (1, F)
    shift = beta_ref[...] - mean * scale                      # (1, F)
    xn = x * scale + shift                                    # (B, F)  2 VPU ops/elem

    # hidden = relu(xn @ W1 + b1)   -- bf16 MXU inputs, f32 accumulation.
    h = jnp.dot(xn.astype(jnp.bfloat16), w1_ref[...],
                preferred_element_type=jnp.float32) + b1_ref[...]
    h = jnp.maximum(h, 0.0)                                   # (B, U_pad)

    # out = relu(h @ W2 + b2)
    y = jnp.dot(h.astype(jnp.bfloat16), w2_ref[...],
                preferred_element_type=jnp.float32) + b2_ref[...]
    o_ref[...] = jnp.maximum(y, 0.0)                          # (B, C_pad), lane-dense


def one_layer_nn_forward(x, gamma, beta, w1, b1, w2, b2):
    """x: (B, 2*context_length, embedding_size) f32; weights are (in, out)."""
    B = x.shape[0]
    x_flat = x.reshape(B, -1)
    F = x_flat.shape[0] and x_flat.shape[1]
    U = w1.shape[1]
    C = w2.shape[1]

    # Pad narrow feature dims to lane width (128) for full MXU passes and
    # unmasked, lane-dense stores. Zero padding keeps the math identical.
    LANE = 128
    U_pad = max(LANE, ((U + LANE - 1) // LANE) * LANE)
    C_pad = max(LANE, ((C + LANE - 1) // LANE) * LANE)

    w1_p = jnp.zeros((F, U_pad), jnp.bfloat16).at[:, :U].set(w1.astype(jnp.bfloat16))
    b1_p = jnp.zeros((1, U_pad), jnp.float32).at[:, :U].set(b1.reshape(1, U))
    w2_p = jnp.zeros((U_pad, C_pad), jnp.bfloat16).at[:U, :C].set(w2.astype(jnp.bfloat16))
    b2_p = jnp.zeros((1, C_pad), jnp.float32).at[:, :C].set(b2.reshape(1, C))
    gamma2 = gamma.reshape(1, F).astype(jnp.float32)
    beta2 = beta.reshape(1, F).astype(jnp.float32)

    full = lambda shape: pl.BlockSpec(shape, lambda: (0, 0))

    cost = pl.CostEstimate(
        flops=2 * B * (F * U_pad + U_pad * C_pad) + 8 * B * F,
        transcendentals=F,  # rsqrt per feature
        bytes_accessed=(B * F * 4 + F * U_pad * 2 + U_pad * C_pad * 2
                        + (2 * F + U_pad + C_pad) * 4 + B * C_pad * 4),
    )

    out_padded = pl.pallas_call(
        _onelayer_kernel,
        out_shape=jax.ShapeDtypeStruct((B, C_pad), jnp.float32),
        in_specs=[
            full((B, F)),          # x
            full((1, F)),          # gamma
            full((1, F)),          # beta
            full((F, U_pad)),      # W1 (in, out), bf16
            full((1, U_pad)),      # b1
            full((U_pad, C_pad)),  # W2 (in, out), bf16
            full((1, C_pad)),      # b2
        ],
        out_specs=full((B, C_pad)),
        cost_estimate=cost,
    )(x_flat, gamma2, beta2, w1_p, b1_p, w2_p, b2_p)

    return out_padded[:, :C]


def _reference(x_flat, gamma, beta, w1, b1, w2, b2):
    mean = jnp.mean(x_flat, axis=0, keepdims=True)
    var = jnp.mean((x_flat - mean) ** 2, axis=0, keepdims=True)
    xn = (x_flat - mean) / jnp.sqrt(var + BN_EPS) * gamma + beta
    h = jnp.maximum(xn @ w1 + b1, 0.0)
    return jnp.maximum(h @ w2 + b2, 0.0)


if __name__ == "__main__":
    # Module hyperparameters: BatchNorm1d(256) forces
    # embedding_size * 2 * context_length == 256.
    context_length = 4
    embedding_size = 32
    units = 32
    num_classes = 10
    B = 8
    F = embedding_size * 2 * context_length  # 256

    key = jax.random.PRNGKey(0)
    kx, kw1, kb1, kw2, kb2 = jax.random.split(key, 5)

    # Input shaped like (batch, 2*context_length, embedding_size).
    x = jax.random.normal(kx, (B, 2 * context_length, embedding_size), dtype=jnp.float32)

    # PyTorch-style uniform(-1/sqrt(fan_in), 1/sqrt(fan_in)) init.
    # Weights stored as (in_features, out_features) == PyTorch weight.T.
    bound1 = 1.0 / jnp.sqrt(jnp.float32(F))
    bound2 = 1.0 / jnp.sqrt(jnp.float32(units))
    w1 = jax.random.uniform(kw1, (F, units), jnp.float32, -bound1, bound1)
    b1 = jax.random.uniform(kb1, (units,), jnp.float32, -bound1, bound1)
    w2 = jax.random.uniform(kw2, (units, num_classes), jnp.float32, -bound2, bound2)
    b2 = jax.random.uniform(kb2, (num_classes,), jnp.float32, -bound2, bound2)

    # BatchNorm affine params at their PyTorch defaults.
    gamma = jnp.ones((F,), jnp.float32)
    beta = jnp.zeros((F,), jnp.float32)

    out = one_layer_nn_forward(x, gamma, beta, w1, b1, w2, b2)
    out = jax.block_until_ready(out)

    ref = _reference(x.reshape(B, -1), gamma, beta, w1, b1, w2, b2)
    assert out.shape == (B, num_classes)
    # bf16 MXU inputs with f32 accumulation: allow bf16-level tolerance.
    assert jnp.allclose(out, ref, atol=3e-2, rtol=3e-2), (
        f"max abs err {jnp.max(jnp.abs(out - ref))}")

    print("KERNEL_OK")
</pallas_src>

<mosaic_0001>
module attributes {stable_mosaic.version = 11 : i64} {
  func.func @_onelayer_kernel(%arg0: memref<8x256xf32, #tpu.memory_space<vmem>>, %arg1: memref<1x256xf32, #tpu.memory_space<vmem>>, %arg2: memref<1x256xf32, #tpu.memory_space<vmem>>, %arg3: memref<256x128xbf16, #tpu.memory_space<vmem>>, %arg4: memref<1x128xf32, #tpu.memory_space<vmem>>, %arg5: memref<128x128xbf16, #tpu.memory_space<vmem>>, %arg6: memref<1x128xf32, #tpu.memory_space<vmem>>, %arg7: memref<8x128xf32, #tpu.memory_space<vmem>>) attributes {dimension_semantics = [], scalar_prefetch = 0 : i64, scratch_operands = 0 : i64, tpu.core_type = #tpu.core_type<tc>} {
    %c0 = arith.constant 0 : index
    %c0_0 = arith.constant 0 : index
    %0 = vector.load %arg0[%c0, %c0_0] : memref<8x256xf32, #tpu.memory_space<vmem>>, vector<8x256xf32>
    %cst = arith.constant dense<0.000000e+00> : vector<256xf32>
    %1 = vector.multi_reduction <add>, %0, %cst [0] : vector<8x256xf32> to vector<256xf32>
    %2 = vector.shape_cast %1 : vector<256xf32> to vector<1x256xf32>
    %cst_1 = arith.constant 8.000000e+00 : f32
    %3 = vector.broadcast %cst_1 : f32 to vector<1x256xf32>
    %4 = arith.divf %2, %3 : vector<1x256xf32>
    %5 = vector.broadcast %4 : vector<1x256xf32> to vector<8x256xf32>
    %6 = arith.subf %0, %5 : vector<8x256xf32>
    %7 = vector.broadcast %4 : vector<1x256xf32> to vector<8x256xf32>
    %8 = arith.subf %0, %7 : vector<8x256xf32>
    %9 = arith.mulf %6, %8 : vector<8x256xf32>
    %cst_2 = arith.constant dense<0.000000e+00> : vector<256xf32>
    %10 = vector.multi_reduction <add>, %9, %cst_2 [0] : vector<8x256xf32> to vector<256xf32>
    %11 = vector.shape_cast %10 : vector<256xf32> to vector<1x256xf32>
    %cst_3 = arith.constant 8.000000e+00 : f32
    %12 = vector.broadcast %cst_3 : f32 to vector<1x256xf32>
    %13 = arith.divf %11, %12 : vector<1x256xf32>
    %c0_4 = arith.constant 0 : index
    %c0_5 = arith.constant 0 : index
    %14 = vector.load %arg1[%c0_4, %c0_5] : memref<1x256xf32, #tpu.memory_space<vmem>>, vector<1x256xf32>
    %cst_6 = arith.constant 9.99999974E-6 : f32
    %15 = vector.broadcast %cst_6 : f32 to vector<1x256xf32>
    %16 = arith.addf %13, %15 : vector<1x256xf32>
    %17 = math.rsqrt %16 : vector<1x256xf32>
    %18 = arith.mulf %14, %17 : vector<1x256xf32>
    %c0_7 = arith.constant 0 : index
    %c0_8 = arith.constant 0 : index
    %19 = vector.load %arg2[%c0_7, %c0_8] : memref<1x256xf32, #tpu.memory_space<vmem>>, vector<1x256xf32>
    %20 = arith.mulf %4, %18 : vector<1x256xf32>
    %21 = arith.subf %19, %20 : vector<1x256xf32>
    %22 = vector.broadcast %18 : vector<1x256xf32> to vector<8x256xf32>
    %23 = arith.mulf %0, %22 : vector<8x256xf32>
    %24 = vector.broadcast %21 : vector<1x256xf32> to vector<8x256xf32>
    %25 = arith.addf %23, %24 : vector<8x256xf32>
    %26 = arith.truncf %25 : vector<8x256xf32> to vector<8x256xbf16>
    %c0_9 = arith.constant 0 : index
    %c0_10 = arith.constant 0 : index
    %27 = vector.load %arg3[%c0_9, %c0_10] : memref<256x128xbf16, #tpu.memory_space<vmem>>, vector<256x128xbf16>
    %cst_11 = arith.constant dense<0.000000e+00> : vector<8x128xf32>
    %28 = tpu.matmul %26, %27, %cst_11 {dimension_numbers = #tpu.dot_dimension_numbers<[1], [0], [0], [1], [0, 0, 1, 1], [], []>} : vector<8x256xbf16>, vector<256x128xbf16>, vector<8x128xf32> -> vector<8x128xf32>
    %c0_12 = arith.constant 0 : index
    %c0_13 = arith.constant 0 : index
    %29 = vector.load %arg4[%c0_12, %c0_13] : memref<1x128xf32, #tpu.memory_space<vmem>>, vector<1x128xf32>
    %30 = vector.broadcast %29 : vector<1x128xf32> to vector<8x128xf32>
    %31 = arith.addf %28, %30 : vector<8x128xf32>
    %cst_14 = arith.constant 0.000000e+00 : f32
    %32 = vector.broadcast %cst_14 : f32 to vector<8x128xf32>
    %33 = arith.maximumf %31, %32 : vector<8x128xf32>
    %34 = arith.truncf %33 : vector<8x128xf32> to vector<8x128xbf16>
    %c0_15 = arith.constant 0 : index
    %c0_16 = arith.constant 0 : index
    %35 = vector.load %arg5[%c0_15, %c0_16] : memref<128x128xbf16, #tpu.memory_space<vmem>>, vector<128x128xbf16>
    %cst_17 = arith.constant dense<0.000000e+00> : vector<8x128xf32>
    %36 = tpu.matmul %34, %35, %cst_17 {dimension_numbers = #tpu.dot_dimension_numbers<[1], [0], [0], [1], [0, 0, 1, 1], [], []>} : vector<8x128xbf16>, vector<128x128xbf16>, vector<8x128xf32> -> vector<8x128xf32>
    %c0_18 = arith.constant 0 : index
    %c0_19 = arith.constant 0 : index
    %37 = vector.load %arg6[%c0_18, %c0_19] : memref<1x128xf32, #tpu.memory_space<vmem>>, vector<1x128xf32>
    %38 = vector.broadcast %37 : vector<1x128xf32> to vector<8x128xf32>
    %39 = arith.addf %36, %38 : vector<8x128xf32>
    %cst_20 = arith.constant 0.000000e+00 : f32
    %40 = vector.broadcast %cst_20 : f32 to vector<8x128xf32>
    %41 = arith.maximumf %39, %40 : vector<8x128xf32>
    %c0_21 = arith.constant 0 : index
    %c0_22 = arith.constant 0 : index
    %42 = vector.load %arg7[%c0_21, %c0_22] : memref<8x128xf32, #tpu.memory_space<vmem>>, vector<8x128xf32>
    tpu.vector_store %arg7[%c0_21, %c0_22], %41 {strides = array<i32>} : memref<8x128xf32, #tpu.memory_space<vmem>>, vector<8x128xf32>,
    return
  }
}

</mosaic_0001>

<bundles_post_ra>
// kernel: tpu_custom_call.1
= control target key start
LH: loop header
LB: loop body
LE: loop exit
PB: predicated region body
PF: predicated region fallthrough
CT: control target
= control target key end

     0   :  { %12 = vsyncpa [#allocation3], 0  ;;  %s826_s0 = inlined_call_operand.hbm [shape: f32[8,256], index: 0, kind: input, shape index: {}]   ;;  %s827_s1 = inlined_call_operand.vmem [shape: f32[1,256], index: 1, kind: input, shape index: {}]   ;;  %s828_s2 = inlined_call_operand.vmem [shape: f32[1,256], index: 2, kind: input, shape index: {}]   ;;  %s829_s3 = inlined_call_operand.hbm [shape: bf16[256,128], index: 3, kind: input, shape index: {}]   ;;  %s830_s4 = inlined_call_operand.vmem [shape: f32[1,128], index: 4, kind: input, shape index: {}]   ;;  %s831_s5 = inlined_call_operand.hbm [shape: bf16[128,128], index: 5, kind: input, shape index: {}]   ;;  %s832_s6 = inlined_call_operand.vmem [shape: f32[1,128], index: 6, kind: input, shape index: {}]   ;;  %s833_s7 = inlined_call_operand.hbm [shape: f32[8,128], index: 7, kind: output, shape index: {}]  }
   0x1   :  { %13 = vsyncpa [#allocation6], 0 }
   0x2   :  { %14 = vsyncpa [#allocation4], 0  ;;  %s690_s24 = smov [#allocation5]   ;;  %s596_s28 = scalar_lea.hbm %s829_s3, 2048 }
   0x3   :  { %s34_s25 = sshll.u32 %s690_s24, 4  ;;  %p597_p0 = scmp.ne.s32.totalorder %s829_s3, %s596_s28  ;;  %s35_s25 = int_to_ptr.vmem [resolvable:$true] %s34_s25 }
   0x4   :  { %p600_p1 = scmp.lt.u32.totalorder %s596_s28, %s829_s3 }
   0x6   :  { %p602_p2 = pnand %p600_p1, %p597_p0 }
   0x8   :  { %605 = shalt.err (!%p602_p2)
}
   0x9   :  { %s606_s10 = scalar_lea.vmem %s35_s25, 2048  ;;  %p611_p4 = scmp.lt.s32.totalorder %s35_s25, %s35_s25 }
   0xa   :  { %p607_p3 = scmp.ne.s32.totalorder %s35_s25, %s606_s10  ;;  %p612_p5 = scmp.lt.s32.totalorder %s606_s10, %s606_s10 }
   0xc   :  { %p613_p6 = por %p612_p5, %p611_p4 }
   0xe   :  { %p614_p7 = pnand %p613_p6, %p607_p3 }
  0x10   :  { %617 = shalt.err (!%p614_p7)
}
  0x11   :  { %s691_s11 = smov 64   ;;  %s692_s12 = smov 4  }
  0x12   :  { %40 = dma.hbm_to_vmem [thread:$0]  %s829_s3, 2048, %s35_s25, [#allocation6], %s691_s11, %s691_s11, %s692_s12  }
  0x13   :  { %s693_s15 = smov [#allocation2]   ;;  %s694_s17 = smov [#allocation7]  }
  0x14   :  { %s21_s16 = sshll.u32 %s693_s15, 4  ;;  %s48_s18 = sshll.u32 %s694_s17, 4  ;;  %s22_s16 = int_to_ptr.vmem [resolvable:$true] %s21_s16  ;;  %s49_s18 = int_to_ptr.vmem [resolvable:$true] %s48_s18 }
  0x15   :  { %s618_s21 = scalar_lea.hbm %s826_s0, 256 }
  0x16   :  { %p619_p8 = scmp.ne.s32.totalorder %s826_s0, %s618_s21  ;;  %p622_p9 = scmp.lt.u32.totalorder %s618_s21, %s826_s0 }
  0x18   :  { %p624_p10 = pnand %p622_p9, %p619_p8 }
  0x1a   :  { %627 = shalt.err (!%p624_p10)
}
  0x1b   :  { %s628_s3 = scalar_lea.vmem %s22_s16, 256  ;;  %p633_p12 = scmp.lt.s32.totalorder %s22_s16, %s22_s16 }
  0x1c   :  { %p629_p11 = scmp.ne.s32.totalorder %s22_s16, %s628_s3  ;;  %p634_p13 = scmp.lt.s32.totalorder %s628_s3, %s628_s3 }
  0x1e   :  { %p635_p0 = por %p634_p13, %p633_p12 }
  0x20   :  { %p636_p1 = pnand %p635_p0, %p629_p11 }
  0x22   :  { %639 = shalt.err (!%p636_p1)
}
  0x23   :  { %24 = dma.hbm_to_vmem [thread:$0]  %s826_s0, 256, %s22_s16, [#allocation3]  }
  0x24   :  { %s640_s30 = scalar_lea.hbm %s831_s5, 1024 }
  0x25   :  { %p641_p2 = scmp.ne.s32.totalorder %s831_s5, %s640_s30  ;;  %p644_p3 = scmp.lt.u32.totalorder %s640_s30, %s831_s5 }
  0x27   :  { %p646_p4 = pnand %p644_p3, %p641_p2 }
  0x29   :  { %649 = shalt.err (!%p646_p4)
}
  0x2a   :  { %s650_s14 = scalar_lea.vmem %s49_s18, 1024  ;;  %p655_p6 = scmp.lt.s32.totalorder %s49_s18, %s49_s18 }
  0x2b   :  { %p651_p5 = scmp.ne.s32.totalorder %s49_s18, %s650_s14  ;;  %p656_p7 = scmp.lt.s32.totalorder %s650_s14, %s650_s14 }
  0x2d   :  { %p657_p8 = por %p656_p7, %p655_p6 }
  0x2f   :  { %p658_p9 = pnand %p657_p8, %p651_p5 }
  0x31   :  { %661 = shalt.err (!%p658_p9)
}
  0x32   :  { %54 = dma.hbm_to_vmem [thread:$0]  %s831_s5, 1024, %s49_s18, [#allocation6], %s691_s11, %s691_s11, %s692_s12  }
  0x33   :  { %684 = dma.done.wait [#allocation3], 256  }
  0x34   :  { %685 = vsyncadd [#allocation3], 4294967040 }
  0x35   :  { %686 = dma.done.wait [#allocation6], 3072  }
  0x36   :  { %687 = vsyncadd [#allocation6], 4294964224  ;;  %v695_v0 = vmov 0.0   ;;  %v568_v1 = vld [vmem:[#allocation5 + $0x40] sm:$0xff]   ;;  %v570_v3 = vld [vmem:[#allocation5 + $0x48] sm:$0xff]   ;;  %v113_v61 = vlaneseq  ;;  %vm697_vm0 = vmmov 0  }
  0x37   :  { %539 = vmatprep.subr.bf16.mxu1 %v695_v0  ;;  %v569_v2 = vld [vmem:[#allocation5] sm:$0xff]   ;;  %508 = vmatprep.subr.bf16.mxu0 %v568_v1  ;;  %v571_v4 = vld [vmem:[#allocation5 + $0x8] sm:$0xff]   ;;  %v572_v5 = vld [vmem:[#allocation5 + $0x50] sm:$0xff]   ;;  %v696_v59 = vmov 1966171168   ;;  %s698_s19 = smov [#allocation8]  }
  0x38   :  { %509 = vmatpush3.bf16.msra.mxu0 %v569_v2  ;;  %v573_v6 = vld [vmem:[#allocation5 + $0x10] sm:$0xff]   ;;  %v574_v7 = vld [vmem:[#allocation5 + $0x58] sm:$0xff]   ;;  %v576_v9 = vld [vmem:[#allocation5 + $0x60] sm:$0xff]   ;;  %v111_v60 = vunpack.c.l.s4 %v696_v59  ;;  %v114_v63 = vshrl.u32 %v113_v61, 7  ;;  %555 = vmatprep.mubr.msk.bf16.mxu1 %vm697_vm0, %v695_v0  ;;  %s472_s20 = sshll.u32 %s698_s19, 4  ;;  %s473_s20 = int_to_ptr.vmem [resolvable:$true] %s472_s20 }
  0x39   :  { %510 = vmatprep.subr.bf16.mxu0 %v570_v3  ;;  %v575_v8 = vld [vmem:[#allocation5 + $0x18] sm:$0xff]   ;;  %v577_v10 = vld [vmem:[#allocation5 + $0x20] sm:$0xff]   ;;  %v578_v11 = vld [vmem:[#allocation5 + $0x68] sm:$0xff]   ;;  %p667_p11 = scmp.lt.s32.totalorder %s473_s20, %s473_s20 }
  0x3a   :  { %v782_v12 = vld [vmem:[#allocation2] sm:$0xff]  ;;  %v784_v13 = vld [vmem:[#allocation2 + $0x8] sm:$0xff]  ;;  %v579_v14 = vld [vmem:[#allocation5 + $0x28] sm:$0xff]   ;;  %v112_v62 = vunpack.c.0.s8 %v111_v60 }
  0x3b   :  { %v69_v15 = vrot.slane %v782_v12, 4  ;;  %v75_v16 = vrot.slane %v784_v13, 4  ;;  %v584_v17 = vld [vmem:[#allocation7] sm:$0xff]   ;;  %v580_v18 = vld [vmem:[#allocation5 + $0x70] sm:$0xff]   ;;  %v585_v21 = vld [vmem:[#allocation7 + $0x8] sm:$0xff]  }
  0x3c   :  { %511 = vmatpush3.bf16.msra.mxu0 %v571_v4  ;;  %540 = vmatpush3.bf16.msra.mxu1 %v584_v17  ;;  %v581_v22 = vld [vmem:[#allocation5 + $0x30] sm:$0xff]   ;;  %v582_v25 = vld [vmem:[#allocation5 + $0x78] sm:$0xff]   ;;  %v588_v39 = vld [vmem:[#allocation7 + $0x20] sm:$0xff]   ;;  %v115_v2 = vsub.s32 %v112_v62, %v114_v63 }
  0x3d   :  { %512 = vmatprep.subr.bf16.mxu0 %v572_v5  ;;  %v70_v19 = vadd.f32 %v69_v15, %v782_v12  ;;  %v76_v20 = vadd.f32 %v75_v16, %v784_v13  ;;  %541 = vmatprep.subr.bf16.mxu1 %v695_v0  ;;  %v586_v28 = vld [vmem:[#allocation7 + $0x10] sm:$0xff]   ;;  %v583_v31 = vld [vmem:[#allocation5 + $0x38] sm:$0xff]   ;;  %v589_v44 = vld [vmem:[#allocation7 + $0x28] sm:$0xff]  }
  0x3e   :  { %v587_v34 = vld [vmem:[#allocation7 + $0x18] sm:$0xff]  }
  0x3f   :  { %v71_v23 = vrot.slane %v70_v19, 2  ;;  %v77_v24 = vrot.slane %v76_v20, 2 }
  0x40   :  { %513 = vmatpush3.bf16.msra.mxu0 %v573_v6  ;;  %542 = vmatpush3.bf16.msra.mxu1 %v585_v21  ;;  %v102_v6 = vld [vmem:[%s827_s1] sm:$0x3] }
  0x41   :  { %514 = vmatprep.subr.bf16.mxu0 %v574_v7  ;;  %v72_v26 = vadd.f32 %v71_v23, %v70_v19  ;;  %v78_v27 = vadd.f32 %v77_v24, %v76_v20  ;;  %543 = vmatprep.subr.bf16.mxu1 %v695_v0  ;;  %v126_v19 = vld [vmem:[%s828_s2] sm:$0x3] }
  0x43   :  { %v73_v29 = vrot.slane %v72_v26, 1  ;;  %v79_v30 = vrot.slane %v78_v27, 1 }
  0x44   :  { %515 = vmatpush3.bf16.msra.mxu0 %v575_v8  ;;  %544 = vmatpush3.bf16.msra.mxu1 %v586_v28  ;;  %v130_v8 = vsub.s32 0, %v114_v63 }
  0x45   :  { %516 = vmatprep.subr.bf16.mxu0 %v576_v9  ;;  %v74_v32 = vadd.f32 %v73_v29, %v72_v26  ;;  %v80_v33 = vadd.f32 %v79_v30, %v78_v27  ;;  %545 = vmatprep.subr.bf16.mxu1 %v695_v0  ;;  %v134_v9 = vsub.s32 1, %v114_v63  ;;  %v590_v30 = vld [vmem:[#allocation7 + $0x30] sm:$0xff]  }
  0x47   :  { %v82_v35 = vmul.f32 0.125, %v74_v32  ;;  %v83_v36 = vmul.f32 0.125, %v80_v33 }
  0x48   :  { %517 = vmatpush3.bf16.msra.mxu0 %v577_v10  ;;  %546 = vmatpush3.bf16.msra.mxu1 %v587_v34 }
  0x49   :  { %518 = vmatprep.subr.bf16.mxu0 %v578_v11  ;;  %v84_v37 = vsub.f32 %v782_v12, %v82_v35  ;;  %v85_v38 = vsub.f32 %v784_v13, %v83_v36  ;;  %547 = vmatprep.subr.bf16.mxu1 %v695_v0 }
  0x4b   :  { %v86_v40 = vmul.f32 %v84_v37, %v84_v37  ;;  %v87_v41 = vmul.f32 %v85_v38, %v85_v38 }
  0x4c   :  { %519 = vmatpush3.bf16.msra.mxu0 %v579_v14  ;;  %548 = vmatpush3.bf16.msra.mxu1 %v588_v39  ;;  %v499_v39 = vld [vmem:[%s832_s6] ss:$0 sm:$0xff] }
  0x4d   :  { %520 = vmatprep.subr.bf16.mxu0 %v580_v18  ;;  %v88_v42 = vrot.slane %v86_v40, 4  ;;  %v94_v43 = vrot.slane %v87_v41, 4  ;;  %549 = vmatprep.subr.bf16.mxu1 %v695_v0 }
  0x4f   :  { %v89_v45 = vadd.f32 %v88_v42, %v86_v40  ;;  %v95_v46 = vadd.f32 %v94_v43, %v87_v41 }
  0x50   :  { %521 = vmatpush3.bf16.msra.mxu0 %v581_v22  ;;  %550 = vmatpush3.bf16.msra.mxu1 %v589_v44 }
  0x51   :  { %522 = vmatprep.subr.bf16.mxu0 %v582_v25  ;;  %v90_v47 = vrot.slane %v89_v45, 2  ;;  %v96_v48 = vrot.slane %v95_v46, 2  ;;  %551 = vmatprep.subr.bf16.mxu1 %v695_v0 }
  0x53   :  { %v91_v49 = vadd.f32 %v90_v47, %v89_v45  ;;  %v97_v50 = vadd.f32 %v96_v48, %v95_v46 }
  0x54   :  { %523 = vmatpush3.bf16.msra.mxu0 %v583_v31  ;;  %552 = vmatpush3.bf16.msra.mxu1 %v590_v30  ;;  %v591_v31 = vld [vmem:[#allocation7 + $0x38] sm:$0xff]  }
  0x55   :  { %v92_v51 = vrot.slane %v91_v49, 1  ;;  %v98_v52 = vrot.slane %v97_v50, 1  ;;  %553 = vmatprep.subr.bf16.mxu1 %v695_v0 }
  0x57   :  { %v93_v53 = vadd.f32 %v92_v51, %v91_v49  ;;  %v99_v54 = vadd.f32 %v98_v52, %v97_v50 }
  0x58   :  { %554 = vmatpush3.bf16.msra.mxu1 %v591_v31 }
  0x59   :  { %v100_v55 = vmul.f32 0.125, %v93_v53  ;;  %v101_v56 = vmul.f32 0.125, %v99_v54 }
  0x5b   :  { %v103_v57 = vadd.f32 1e-05, %v100_v55  ;;  %v104_v58 = vadd.f32 1e-05, %v101_v56 }
  0x5d   :  { %592 = vrsqrt.f32 %v103_v57 }
  0x5e   :  { %594 = vrsqrt.f32 %v104_v58 }
  0x67   :  { %v593_v1 = vpop.eup %592 }
  0x68   :  { %v595_v3 = vpop.eup %594 }
  0x69   :  { %v109_v4 = vcombine.low %v593_v1, %v595_v3 }
  0x6b   :  { %v116_v5 = vrot.slane %v109_v4, %v115_v2 }
  0x6d   :  { %v123_v7 = vrot.slane %v116_v5, %v115_v2 }
  0x6f   :  { %v125_v10 = vmul.f32 %v123_v7, %v102_v6 }
  0x71   :  { %v131_v11 = vrot.slane %v125_v10, %v130_v8  ;;  %v135_v14 = vrot.slane %v125_v10, %v134_v9 }
  0x73   :  { %v138_v15 = vmul.f32 %v131_v11, %v82_v35  ;;  %v139_v16 = vmul.f32 %v135_v14, %v83_v36  ;;  %v160_v22 = vmul.f32 %v135_v14, %v784_v13  ;;  %v159_v23 = vmul.f32 %v131_v11, %v782_v12  ;;  %v482_v12 = vld [vmem:[%s830_s4] ss:$0 sm:$0xff]  ;;  %s662_s4 = scalar_lea.vmem %s473_s20, 128 }
  0x74   :  { %p663_p10 = scmp.ne.s32.totalorder %s473_s20, %s662_s4  ;;  %p668_p12 = scmp.lt.s32.totalorder %s662_s4, %s662_s4 }
  0x75   :  { %v142_v17 = vcombine.low %v138_v15, %v139_v16 }
  0x76   :  { %p669_p13 = por %p668_p12, %p667_p11 }
  0x77   :  { %v149_v18 = vrot.slane %v142_v17, %v115_v2 }
  0x78   :  { %p670_p0 = pnand %p669_p13, %p663_p10 }
  0x79   :  { %v156_v20 = vrot.slane %v149_v18, %v115_v2 }
  0x7b   :  { %v158_v21 = vsub.f32 %v126_v19, %v156_v20 }
  0x7d   :  { %v169_v24 = vrot.slane %v158_v21, %v134_v9  ;;  %v165_v25 = vrot.slane %v158_v21, %v130_v8 }
  0x7f   :  { %v173_v26 = vadd.f32 %v169_v24, %v160_v22  ;;  %v172_v27 = vadd.f32 %v165_v25, %v159_v23 }
  0x81   :  { %v175_v28 = vpack.c.bf16 %v173_v26, %v173_v26  ;;  %v174_v29 = vpack.c.bf16 %v172_v27, %v172_v27 }
  0x83   :  { %343 = vmatprep.mubr.bf16.mxu0 %v175_v28 }
  0x84   :  { %344 = vmatmul.mubr.bf16.vlgmr.msra.gmra.mrb[0].mxu0 %v174_v29 }
 0x157   :  { %v524_v13 = vpop.f32.mrb[0].mxu0 }
 0x158   :  { %v525_v32 = vpop.f32.mrb[1].mxu0 }
 0x159   :  { %v526_v33 = vadd.f32 %v525_v32, %v524_v13  ;;  %v527_v34 = vpop.f32.mrb[2].mxu0 }
 0x15a   :  { %v528_v35 = vpop.f32.mrb[3].mxu0 }
 0x15b   :  { %v346_v36 = vadd.f32 %v526_v33, %v482_v12 }
 0x15d   :  { %v351_v37 = vmax.f32 %v346_v36, 0.0 }
 0x15f   :  { %v352_v38 = vpack.c.bf16 %v351_v37, %v351_v37 }
 0x161   :  { %556 = vmatmul.mubr.bf16.vlgmr.msra.gmra.mrb[0].mxu1 %v352_v38 }
 0x234   :  { %v458_v40 = vpop.f32.mrb[0].mxu1 }
 0x235   :  { %v459_v0 = vadd.f32 %v499_v39, %v458_v40  ;;  %v557_v41 = vpop.f32.mrb[1].mxu1 }
 0x236   :  { %v461_v42 = vpop.f32.mrb[2].mxu1 }
 0x237   :  { %v464_v43 = vmax.f32 %v459_v0, 0.0  ;;  %v558_v44 = vpop.f32.mrb[3].mxu1 }
 0x239   :  { %465 = vst [vmem:[#allocation8] sm:$0xff] %v464_v43 }
 0x23a   :  { %673 = shalt.err (!%p670_p0)
}
 0x23b   :  { %s674_s6 = scalar_lea.hbm %s833_s7, 128 }
 0x23c   :  { %p675_p1 = scmp.ne.s32.totalorder %s833_s7, %s674_s6  ;;  %p678_p2 = scmp.lt.u32.totalorder %s674_s6, %s833_s7 }
 0x23e   :  { %p680_p3 = pnand %p678_p2, %p675_p1 }
 0x240   :  { %683 = shalt.err (!%p680_p3)
}
 0x241   :  { %475 = dma.vmem_to_hbm [thread:$0]  %s473_s20, 128, %s833_s7, [#allocation4]  }
 0x242   :  { %688 = dma.done.wait [#allocation4], 128  }
 0x243   :  { %689 = vsyncadd [#allocation4], 4294967168 }
 0x244   :  { %479 = vsyncpa [#allocation3], 1 }
 0x245   :  { %480 = vsyncpa [#allocation6], 1 }
 0x246   :  { %481 = vsyncpa [#allocation4], 1 }

</bundles_post_ra>
